<compile_context>
chip_gen: v6e
topology: v6e:2x2x1
jax: 0.10.0
libtpu: 0.0.40
codegen_flags: <defaults>
</compile_context>

<pallas_src>
import functools

import jax
import jax.numpy as jnp
from jax.experimental import pallas as pl
from jax.experimental.pallas import tpu as pltpu


def _round_up(x, m):
    return ((x + m - 1) // m) * m


def _fc_kernel(x_ref, w_ref, b_ref, y_ref, acc_ref, *, k_total, tk, mask_k):
    # x_ref: (tm, tk), w_ref: (tk, tn), b_ref: (1, tn), y_ref: (tm, tn)
    k = pl.program_id(2)

    @pl.when(k == 0)
    def _init():
        acc_ref[...] = jnp.zeros_like(acc_ref)

    x = x_ref[...]
    if mask_k:
        # Last K block is ragged: zero the columns that lie past the real K
        # extent so the (zero-padded) weight tail contributes exactly 0.
        col = jax.lax.broadcasted_iota(jnp.int32, x.shape, dimension=1)
        x = jnp.where(k * tk + col < k_total, x, 0.0)

    acc_ref[...] += jnp.dot(x, w_ref[...], preferred_element_type=jnp.float32)

    @pl.when(k == pl.num_programs(2) - 1)
    def _finalize():
        y_ref[...] = (acc_ref[...] + b_ref[...]).astype(y_ref.dtype)


def _linear_pallas(x, w_t, bias, *, tm_max=1024, tn_max=512, tk_max=1024):
    """y = x @ w_t + bias.  x: (N, K), w_t: (K, O), bias: (O,)."""
    N, K = x.shape
    O = w_t.shape[1]

    # Tile selection: tm multiple of 8, tn multiple of 128 (lane-dense output),
    # tk = full K when it fits, else a 128-aligned chunk with K-tail masking.
    tm = min(tm_max, _round_up(N, 8))
    O_pad = _round_up(O, 128)
    tn = min(tn_max, O_pad)
    tk = K if K <= tk_max else tk_max
    K_pad = _round_up(K, tk)

    # Pad only the small operands (weight / bias); feats is streamed as-is.
    w_p = w_t
    if (K_pad, O_pad) != (K, O):
        w_p = jnp.zeros((K_pad, O_pad), w_t.dtype).at[:K, :O].set(w_t)
    b_p = jnp.zeros((1, O_pad), bias.dtype).at[0, :O].set(bias)

    grid = (pl.cdiv(N, tm), pl.cdiv(O_pad, tn), K_pad // tk)

    kernel = functools.partial(
        _fc_kernel, k_total=K, tk=tk, mask_k=(K % tk != 0))

    y_p = pl.pallas_call(
        kernel,
        out_shape=jax.ShapeDtypeStruct((N, O_pad), x.dtype),
        grid_spec=pltpu.PrefetchScalarGridSpec(
            num_scalar_prefetch=0,
            grid=grid,
            in_specs=[
                pl.BlockSpec((tm, tk), lambda i, j, k: (i, k)),
                pl.BlockSpec((tk, tn), lambda i, j, k: (k, j)),
                pl.BlockSpec((1, tn), lambda i, j, k: (0, j)),
            ],
            out_specs=pl.BlockSpec((tm, tn), lambda i, j, k: (i, j)),
            scratch_shapes=[pltpu.VMEM((tm, tn), jnp.float32)],
        ),
        compiler_params=pltpu.CompilerParams(
            dimension_semantics=("parallel", "parallel", "arbitrary"),
            vmem_limit_bytes=32 * 1024 * 1024,
        ),
    )(x, w_p, b_p)

    # Slice the lane-padded columns back off (cheap: N x O_pad read, N x O write).
    return y_p[:, :O]


def fc_layer_forward(feats, weight, bias):
    """FCLayer.forward: feats (N, in_size); weight (out_size, in_size);
    bias (out_size,).  Returns (feats, feats @ W.T + b)."""
    y = _linear_pallas(feats, weight.T, bias)
    # Pass-through output is the unmodified input tensor (no kernel copy).
    return feats, y


if __name__ == "__main__":
    key = jax.random.PRNGKey(0)

    def make_case(key, N, in_size, out_size):
        k_x, k_w, k_b = jax.random.split(key, 3)
        feats = jax.random.normal(k_x, (N, in_size), dtype=jnp.float32)
        bound = 1.0 / (in_size ** 0.5)  # mimic nn.Linear default init
        weight = jax.random.uniform(k_w, (out_size, in_size), jnp.float32,
                                    minval=-bound, maxval=bound)
        bias = jax.random.uniform(k_b, (out_size,), jnp.float32,
                                  minval=-bound, maxval=bound)
        return feats, weight, bias

    k0, k1, k2, k3 = jax.random.split(key, 4)
    cases = [
        make_case(k0, 8, 32, 1),       # module defaults: out_size=1 -> lane-padded out
        make_case(k1, 300, 200, 10),   # N not multiple of 8, O padded -> ragged blocks
        make_case(k2, 1100, 160, 3),   # N > tm -> ragged trailing M grid block
        make_case(k3, 48, 1100, 2),    # K > tk -> K-tiled accumulator + K-tail mask
    ]

    for feats, weight, bias in cases:
        feats_out, y = fc_layer_forward(feats, weight, bias)
        jax.block_until_ready((feats_out, y))

        y_ref = feats @ weight.T + bias
        assert feats_out is feats, "feats pass-through should be the input"
        assert y.shape == (feats.shape[0], weight.shape[0])
        assert jnp.allclose(y, y_ref, atol=1e-4, rtol=1e-4), "linear mismatch"

    print("KERNEL_OK")
</pallas_src>

<mosaic_0001>
module attributes {stable_mosaic.version = 11 : i64} {
  func.func @_fc_kernel(%arg0: i32, %arg1: i32, %arg2: i32, %arg3: memref<8x32xf32, #tpu.memory_space<vmem>>, %arg4: memref<32x128xf32, #tpu.memory_space<vmem>>, %arg5: memref<1x128xf32, #tpu.memory_space<vmem>>, %arg6: memref<8x128xf32, #tpu.memory_space<vmem>>, %arg7: memref<8x128xf32, #tpu.memory_space<vmem>>) attributes {dimension_semantics = [#tpu.dimension_semantics<parallel>, #tpu.dimension_semantics<parallel>, #tpu.dimension_semantics<arbitrary>], iteration_bounds = array<i64: 1, 1, 1>, scalar_prefetch = 0 : i64, scratch_operands = 1 : i64, tpu.core_type = #tpu.core_type<tc>, window_params = [{transform_indices = @transform_0, window_bounds = array<i64: 8, 32>}, {transform_indices = @transform_1, window_bounds = array<i64: 32, 128>}, {transform_indices = @transform_2, window_bounds = array<i64: 1, 128>}, {transform_indices = @transform_3, window_bounds = array<i64: 8, 128>}]} {
    %c0_i32 = arith.constant 0 : i32
    %0 = arith.cmpi eq, %arg2, %c0_i32 : i32
    %1 = arith.extui %0 : i1 to i32
    %c0_i32_0 = arith.constant 0 : i32
    %2 = arith.cmpi ne, %1, %c0_i32_0 : i32
    scf.if %2 {
      %cst_10 = arith.constant 0.000000e+00 : f32
      %12 = vector.broadcast %cst_10 : f32 to vector<8x128xf32>
      %c0_11 = arith.constant 0 : index
      %c0_12 = arith.constant 0 : index
      %13 = vector.load %arg7[%c0_11, %c0_12] : memref<8x128xf32, #tpu.memory_space<vmem>>, vector<8x128xf32>
      tpu.vector_store %arg7[%c0_11, %c0_12], %12 {strides = array<i32>} : memref<8x128xf32, #tpu.memory_space<vmem>>, vector<8x128xf32>,
    } else {
    }
    %c0 = arith.constant 0 : index
    %c0_1 = arith.constant 0 : index
    %3 = vector.load %arg3[%c0, %c0_1] : memref<8x32xf32, #tpu.memory_space<vmem>>, vector<8x32xf32>
    %c0_2 = arith.constant 0 : index
    %c0_3 = arith.constant 0 : index
    %4 = vector.load %arg7[%c0_2, %c0_3] : memref<8x128xf32, #tpu.memory_space<vmem>>, vector<8x128xf32>
    %c0_4 = arith.constant 0 : index
    %c0_5 = arith.constant 0 : index
    %5 = vector.load %arg4[%c0_4, %c0_5] : memref<32x128xf32, #tpu.memory_space<vmem>>, vector<32x128xf32>
    %cst = arith.constant dense<0.000000e+00> : vector<8x128xf32>
    %6 = tpu.matmul %3, %5, %cst {dimension_numbers = #tpu.dot_dimension_numbers<[1], [0], [0], [1], [0, 0, 1, 1], [], []>} : vector<8x32xf32>, vector<32x128xf32>, vector<8x128xf32> -> vector<8x128xf32>
    %7 = arith.addf %4, %6 : vector<8x128xf32>
    %c0_6 = arith.constant 0 : index
    %c0_7 = arith.constant 0 : index
    %8 = vector.load %arg7[%c0_6, %c0_7] : memref<8x128xf32, #tpu.memory_space<vmem>>, vector<8x128xf32>
    tpu.vector_store %arg7[%c0_6, %c0_7], %7 {strides = array<i32>} : memref<8x128xf32, #tpu.memory_space<vmem>>, vector<8x128xf32>,
    %c0_i32_8 = arith.constant 0 : i32
    %9 = arith.cmpi eq, %arg2, %c0_i32_8 : i32
    %10 = arith.extui %9 : i1 to i32
    %c0_i32_9 = arith.constant 0 : i32
    %11 = arith.cmpi ne, %10, %c0_i32_9 : i32
    scf.if %11 {
      %c0_10 = arith.constant 0 : index
      %c0_11 = arith.constant 0 : index
      %12 = vector.load %arg7[%c0_10, %c0_11] : memref<8x128xf32, #tpu.memory_space<vmem>>, vector<8x128xf32>
      %c0_12 = arith.constant 0 : index
      %c0_13 = arith.constant 0 : index
      %13 = vector.load %arg5[%c0_12, %c0_13] : memref<1x128xf32, #tpu.memory_space<vmem>>, vector<1x128xf32>
      %14 = vector.broadcast %13 : vector<1x128xf32> to vector<8x128xf32>
      %15 = arith.addf %12, %14 : vector<8x128xf32>
      %c0_14 = arith.constant 0 : index
      %c0_15 = arith.constant 0 : index
      %16 = vector.load %arg6[%c0_14, %c0_15] : memref<8x128xf32, #tpu.memory_space<vmem>>, vector<8x128xf32>
      tpu.vector_store %arg6[%c0_14, %c0_15], %15 {strides = array<i32>} : memref<8x128xf32, #tpu.memory_space<vmem>>, vector<8x128xf32>,
    } else {
    }
    return
  }
  func.func @transform_0(%arg0: i32, %arg1: i32, %arg2: i32) -> (i32, i32) {
    %c0_i32 = arith.constant 0 : i32
    return %arg0, %arg2 : i32, i32
  }
  func.func @transform_1(%arg0: i32, %arg1: i32, %arg2: i32) -> (i32, i32) {
    %c0_i32 = arith.constant 0 : i32
    return %arg2, %arg1 : i32, i32
  }
  func.func @transform_2(%arg0: i32, %arg1: i32, %arg2: i32) -> (i32, i32) {
    %c0_i32 = arith.constant 0 : i32
    %c0_i32_0 = arith.constant 0 : i32
    return %c0_i32, %arg1 : i32, i32
  }
  func.func @transform_3(%arg0: i32, %arg1: i32, %arg2: i32) -> (i32, i32) {
    %c0_i32 = arith.constant 0 : i32
    return %arg0, %arg1 : i32, i32
  }
}

</mosaic_0001>

<bundles_post_ra>
// kernel: tpu_custom_call.1
= control target key start
LH: loop header
LB: loop body
LE: loop exit
PB: predicated region body
PF: predicated region fallthrough
CT: control target
= control target key end

     0   :  { %8 = vsyncpa [#allocation4], 0  ;;  %s287_s0 = inlined_call_operand.hbm [shape: f32[8,32], index: 0, kind: input, shape index: {}]   ;;  %s288_s1 = inlined_call_operand.hbm [shape: f32[32,128], index: 1, kind: input, shape index: {}]   ;;  %s289_s2 = inlined_call_operand.vmem [shape: f32[1,128], index: 2, kind: input, shape index: {}]   ;;  %s290_s3 = inlined_call_operand.hbm [shape: f32[8,128], index: 3, kind: output, shape index: {}]  }
   0x1   :  { %9 = vsyncpa [#allocation7], 0 }
   0x2   :  { %10 = vsyncpa [#allocation5], 0  ;;  %s248_s12 = smov [#allocation3]   ;;  %s249_s14 = smov [#allocation6]  }
   0x3   :  { %s17_s13 = sshll.u32 %s248_s12, 4  ;;  %s26_s15 = sshll.u32 %s249_s14, 4  ;;  %s18_s13 = int_to_ptr.vmem [resolvable:$true] %s17_s13  ;;  %s27_s15 = int_to_ptr.vmem [resolvable:$true] %s26_s15 }
   0x4   :  { %s190_s16 = scalar_lea.vmem %s18_s13, 128  ;;  %p195_p1 = scmp.lt.s32.totalorder %s18_s13, %s18_s13 }
   0x5   :  { %p191_p0 = scmp.ne.s32.totalorder %s18_s13, %s190_s16  ;;  %p196_p2 = scmp.lt.s32.totalorder %s190_s16, %s190_s16 }
   0x7   :  { %p197_p3 = por %p196_p2, %p195_p1 }
   0x9   :  { %p198_p4 = pnand %p197_p3, %p191_p0 }
   0xb   :  { %201 = shalt.err (!%p198_p4)
}
   0xc   :  { %20 = dma.hbm_to_vmem [thread:$0]  %s287_s0, 128, %s18_s13, [#allocation4]  }
   0xd   :  { %s210_s19 = scalar_lea.vmem %s27_s15, 512  ;;  %p215_p6 = scmp.lt.s32.totalorder %s27_s15, %s27_s15 }
   0xe   :  { %p211_p5 = scmp.ne.s32.totalorder %s27_s15, %s210_s19  ;;  %p216_p7 = scmp.lt.s32.totalorder %s210_s19, %s210_s19 }
  0x10   :  { %p217_p8 = por %p216_p7, %p215_p6 }
  0x12   :  { %p218_p9 = pnand %p217_p8, %p211_p5 }
  0x14   :  { %221 = shalt.err (!%p218_p9)
}
  0x15   :  { %s250_s20 = smov 128   ;;  %s251_s21 = smov 8  }
  0x16   :  { %32 = dma.hbm_to_vmem [thread:$0]  %s288_s1, 512, %s27_s15, [#allocation7], %s250_s20, %s250_s20, %s251_s21  }
  0x17   :  { %242 = dma.done.wait [#allocation4], 128  }
  0x18   :  { %243 = vsyncadd [#allocation4], 4294967168 }
  0x19   :  { %244 = dma.done.wait [#allocation7], 512  }
  0x1a   :  { %245 = vsyncadd [#allocation7], 4294966784  ;;  %v252_v0 = vmov 0.0   ;;  %vm253_vm0 = vmmov 0   ;;  %v51_v1 = vld [vmem:[#allocation6 + $0x18] sm:$0xff]  ;;  %v50_v2 = vld [vmem:[#allocation6 + $0x10] sm:$0xff] }
  0x1b   :  { %164 = vmatprep.subr.mxu0 %v252_v0  ;;  %172 = vmatprep.mubr.msk.f32.mxu0 %vm253_vm0, %v252_v0  ;;  %v49_v3 = vld [vmem:[#allocation6 + $0x8] sm:$0xff]  ;;  %v48_v4 = vld [vmem:[#allocation6] sm:$0xff]  ;;  %v46_v5 = vld [vmem:[#allocation3] sm:$0xff]  ;;  %vm52_vm1 = vcmask 261120   ;;  %s254_s24 = smov [#allocation8]  }
  0x1c   :  { %165 = vmatpush3.msra.mxu0 %v51_v1  ;;  %v158_v6 = vld [vmem:[%s289_s2] ss:$0 sm:$0xff]  ;;  %s147_s25 = sshll.u32 %s254_s24, 4  ;;  %s148_s25 = int_to_ptr.vmem [resolvable:$true] %s147_s25 }
  0x1d   :  { %166 = vmatprep.subr.mxu0 %v252_v0  ;;  %s222_s26 = scalar_lea.vmem %s148_s25, 128  ;;  %p227_p11 = scmp.lt.s32.totalorder %s148_s25, %s148_s25 }
  0x1e   :  { %167 = vmatpush3.msra.mxu0 %v50_v2  ;;  %p223_p10 = scmp.ne.s32.totalorder %s148_s25, %s222_s26  ;;  %p228_p12 = scmp.lt.s32.totalorder %s222_s26, %s222_s26 }
  0x1f   :  { %168 = vmatprep.subr.mxu0 %v252_v0 }
  0x20   :  { %169 = vmatpush3.msra.mxu0 %v49_v3  ;;  %p229_p13 = por %p228_p12, %p227_p11 }
  0x21   :  { %170 = vmatprep.subr.mxu0 %v252_v0 }
  0x22   :  { %171 = vmatpush3.msra.mxu0 %v48_v4  ;;  %p230_p0 = pnand %p229_p13, %p223_p10 }
  0x23   :  { %173 = vmatmul.mubr.msk.f32.vlgmr.msra.gmra.mxu0 %vm52_vm1, %v46_v5 }
  0xe3   :  { %v122_v7 = vpop.f32.mrf.mxu0 }
  0xe4   :  { %v139_v8 = vadd.f32 %v158_v6, %v122_v7 }
  0xe5   :  { %v174_v9 = vpop.f32.mrf.mxu0 }
  0xe6   :  { %140 = vst [vmem:[#allocation8] sm:$0xff] %v139_v8 }
  0xe7   :  { %233 = shalt.err (!%p230_p0)
}
  0xe8   :  { %150 = dma.vmem_to_hbm [thread:$0]  %s148_s25, 128, %s290_s3, [#allocation5]  }
  0xe9   :  { %246 = dma.done.wait [#allocation5], 128  }
  0xea   :  { %247 = vsyncadd [#allocation5], 4294967168 }
  0xeb   :  { %154 = vsyncpa [#allocation4], 1 }
  0xec   :  { %155 = vsyncpa [#allocation7], 1 }
  0xed   :  { %156 = vsyncpa [#allocation5], 1 }

</bundles_post_ra>
